<compile_context>
chip_gen: v7x
topology: tpu7x:2x2x1
jax: 0.10.0
libtpu: 0.0.40
codegen_flags: <defaults>
</compile_context>

<pallas_src>
import functools

import jax
import jax.numpy as jnp
from jax.experimental import pallas as pl
from jax.experimental.pallas import tpu as pltpu


_LANES = 128
_SUB_ROWS = 128                       # in-kernel sub-chunk: k stays in vregs
_BLOCK_VMEM_BUDGET = 24 * 1024 * 1024  # double-buffered (in + step*out) blocks
_VMEM_LIMIT = 32 * 1024 * 1024         # scoped VMEM limit: safe on v5e/v6e/v7x


def _ttfs_kernel(x_ref, o_ref, *, step, sub_rows, num_sub):
    """One grid point = one row tile; all `step` time steps computed here.

    PyTorch reference (Encoder.ttfs):
        mask = (x*step <= step-i) & (x*step > step-i-1)
        out[i, mask] = 1/(i+1)
    Equivalent (bit-exact): ceil(x*step) == step - i.
    """

    def process(r0):
        x = x_ref[pl.ds(r0, sub_rows), :].astype(jnp.float32)
        k = jnp.ceil(x * jnp.float32(step))          # hoisted once per sub-chunk
        for i in range(step):                        # static unroll (step is small)
            spikes = jnp.where(k == jnp.float32(step - i),
                               jnp.float32(1.0 / (i + 1)),
                               jnp.float32(0.0))
            o_ref[i, pl.ds(r0, sub_rows), :] = spikes.astype(o_ref.dtype)

    if num_sub == 1:
        process(0)
    else:
        def body(c, carry):
            process(pl.multiple_of(c * sub_rows, sub_rows))
            return carry
        jax.lax.fori_loop(0, num_sub, body, 0)


def _pick_tile_rows(rows, step, out_itemsize):
    """Row tile: big enough for ~85% of HBM BW (>=512 rows when possible), small
    enough to keep >=4 grid tiles (megacore + pipelining) and fit the VMEM budget."""
    granule = 8 if out_itemsize >= 4 else 16         # sublane granule for out dtype
    per_row = (4 + step * out_itemsize) * _LANES * 2  # in(f32) + step*out, x2 buffers
    t = int(_BLOCK_VMEM_BUDGET // per_row)
    t = min(t, 1024, rows)
    # Prefer >= 4 grid tiles (v7x two-TC split + DMA/compute overlap), else >= 2.
    for denom in (4, 2):
        cap = ((rows // denom) // granule) * granule
        if cap >= granule:
            t = min(t, cap)
            break
    if t >= _SUB_ROWS:
        t = (t // _SUB_ROWS) * _SUB_ROWS             # multiple of the sub-chunk
    else:
        t = max(granule, (t // granule) * granule)
    return min(t, rows)


def ttfs_encode(inputs, step, out_dtype=jnp.float32):
    """Pallas TTFS encoder. inputs: any-shaped array -> (step, *inputs.shape)."""
    orig_shape = inputs.shape
    flat = inputs.reshape(-1)                         # original dtype; cast in-kernel
    n = flat.shape[0]

    # Pad ONLY to the 8x128 base (pad value 0 never spikes); avoid padding to a
    # tile multiple so no extra HBM copy for already-aligned inputs.
    base = 8 * _LANES
    padded = ((n + base - 1) // base) * base
    if padded != n:
        flat = jnp.pad(flat, (0, padded - n))
    rows = padded // _LANES
    x2d = flat.reshape(rows, _LANES)

    out_itemsize = jnp.dtype(out_dtype).itemsize
    tile_rows = _pick_tile_rows(rows, step, out_itemsize)
    num_tiles = pl.cdiv(rows, tile_rows)              # ragged tail handled by Pallas
    sub_rows = min(_SUB_ROWS, tile_rows)
    num_sub = tile_rows // sub_rows

    kernel = functools.partial(_ttfs_kernel, step=step,
                               sub_rows=sub_rows, num_sub=num_sub)

    cost = pl.CostEstimate(
        flops=3 * step * padded,
        transcendentals=0,
        bytes_accessed=(step * out_itemsize + flat.dtype.itemsize) * padded,
    )

    out = pl.pallas_call(
        kernel,
        out_shape=jax.ShapeDtypeStruct((step, rows, _LANES), out_dtype),
        grid_spec=pltpu.PrefetchScalarGridSpec(
            num_scalar_prefetch=0,
            grid=(num_tiles,),
            in_specs=[pl.BlockSpec((tile_rows, _LANES), lambda r: (r, 0))],
            out_specs=pl.BlockSpec((step, tile_rows, _LANES), lambda r: (0, r, 0)),
        ),
        compiler_params=pltpu.CompilerParams(
            dimension_semantics=("parallel",),
            vmem_limit_bytes=_VMEM_LIMIT,
        ),
        cost_estimate=cost,
    )(x2d)

    out = out.reshape(step, padded)
    if padded != n:                                   # only for n not a multiple of 1024
        out = out[:, :n]
    return out.reshape((step,) + tuple(orig_shape))


def ttfs_reference(inputs, step):
    """Pure-JAX reference mirroring the PyTorch loop."""
    x = inputs.astype(jnp.float32)
    outs = []
    for i in range(step):
        mask = (x * step <= step - i) & (x * step > step - i - 1)
        outs.append(jnp.where(mask, 1.0 / (i + 1), 0.0))
    return jnp.stack(outs, axis=0)


class PallasEncoder:
    """Pallas port of Encoder(step, encode_type='ttfs').

    'ttfs' has no learnable parameters. deletion_prob / shift_var default to None
    (no-op), exactly as in the PyTorch forward.
    """
    # TODO(synk): encode_type='auto' (AutoEncoder MLP), 'rate', 'phase', 'direct',
    # and the stochastic delete/shift paths are not implemented here; the default
    # forward path ('ttfs', no deletion/shift) is fully covered.

    def __init__(self, step, encode_type="ttfs", out_dtype=jnp.float32):
        assert encode_type == "ttfs", "only 'ttfs' implemented as a Pallas kernel"
        self.step = step
        self.out_dtype = out_dtype

    def __call__(self, inputs, deletion_prob=None, shift_var=None):
        assert deletion_prob is None and shift_var is None
        return ttfs_encode(inputs, self.step, out_dtype=self.out_dtype)


if __name__ == "__main__":
    step = 8
    B, C, H, W = 2, 4, 16, 16

    key = jax.random.PRNGKey(0)
    # inputs in [0, 1) like normalized pixel intensities
    x = jax.random.uniform(key, (B, C, H, W), dtype=jnp.float32)

    enc = PallasEncoder(step, encode_type="ttfs")
    out = jax.block_until_ready(enc(x))
    assert out.shape == (step, B, C, H, W), out.shape
    ref = jax.block_until_ready(ttfs_reference(x, step))
    assert jnp.array_equal(out, ref), "f32 mismatch vs reference"

    # Optional bf16 spike output (halves HBM write traffic; values == bf16(1/(i+1))).
    out_bf16 = jax.block_until_ready(ttfs_encode(x, step, out_dtype=jnp.bfloat16))
    assert jnp.array_equal(out_bf16, ref.astype(jnp.bfloat16)), "bf16 mismatch"

    # Ragged case: rows not a multiple of the tile (exercises cdiv grid + masked tail).
    x2 = jax.random.uniform(jax.random.PRNGKey(1), (1032, 128), dtype=jnp.float32)
    out2 = jax.block_until_ready(ttfs_encode(x2, step))
    assert jnp.array_equal(out2, ttfs_reference(x2, step)), "ragged-tile mismatch"

    # Odd element count (pad-to-base + final slice path).
    x3 = jax.random.uniform(jax.random.PRNGKey(2), (3, 5, 7), dtype=jnp.float32)
    out3 = jax.block_until_ready(ttfs_encode(x3, step))
    assert jnp.array_equal(out3, ttfs_reference(x3, step)), "odd-size mismatch"

    print("KERNEL_OK")
</pallas_src>

<mosaic_0001>
module attributes {stable_mosaic.version = 11 : i64} {
  func.func @_ttfs_kernel(%arg0: i32, %arg1: memref<8x128xf32, #tpu.memory_space<vmem>>, %arg2: memref<8x8x128xf32, #tpu.memory_space<vmem>>) attributes {dimension_semantics = [#tpu.dimension_semantics<parallel>], iteration_bounds = array<i64: 2>, scalar_prefetch = 0 : i64, scratch_operands = 0 : i64, tpu.core_type = #tpu.core_type<tc>, window_params = [{transform_indices = @transform_0, window_bounds = array<i64: 8, 128>}, {transform_indices = @transform_1, window_bounds = array<i64: 8, 8, 128>}]} {
    %c0 = arith.constant 0 : index
    %c0_0 = arith.constant 0 : index
    %0 = vector.load %arg1[%c0, %c0_0] : memref<8x128xf32, #tpu.memory_space<vmem>>, vector<8x128xf32>
    %cst = arith.constant 8.000000e+00 : f32
    %1 = vector.broadcast %cst : f32 to vector<8x128xf32>
    %2 = arith.mulf %0, %1 : vector<8x128xf32>
    %3 = math.ceil %2 : vector<8x128xf32>
    %cst_1 = arith.constant 8.000000e+00 : f32
    %4 = vector.broadcast %cst_1 : f32 to vector<8x128xf32>
    %5 = arith.cmpf oeq, %3, %4 : vector<8x128xf32>
    %cst_2 = arith.constant 1.000000e+00 : f32
    %cst_3 = arith.constant 0.000000e+00 : f32
    %6 = vector.broadcast %cst_2 : f32 to vector<8x128xf32>
    %7 = vector.broadcast %cst_3 : f32 to vector<8x128xf32>
    %8 = arith.select %5, %6, %7 : vector<8x128xi1>, vector<8x128xf32>
    %c0_4 = arith.constant 0 : index
    %c0_5 = arith.constant 0 : index
    %c0_6 = arith.constant 0 : index
    %9 = vector.load %arg2[%c0_4, %c0_5, %c0_6] : memref<8x8x128xf32, #tpu.memory_space<vmem>>, vector<1x8x128xf32>
    %10 = vector.shape_cast %9 : vector<1x8x128xf32> to vector<8x128xf32>
    %11 = vector.shape_cast %8 : vector<8x128xf32> to vector<1x8x128xf32>
    tpu.vector_store %arg2[%c0_4, %c0_5, %c0_6], %11 {strides = array<i32>} : memref<8x8x128xf32, #tpu.memory_space<vmem>>, vector<1x8x128xf32>,
    %cst_7 = arith.constant 7.000000e+00 : f32
    %12 = vector.broadcast %cst_7 : f32 to vector<8x128xf32>
    %13 = arith.cmpf oeq, %3, %12 : vector<8x128xf32>
    %cst_8 = arith.constant 5.000000e-01 : f32
    %cst_9 = arith.constant 0.000000e+00 : f32
    %14 = vector.broadcast %cst_8 : f32 to vector<8x128xf32>
    %15 = vector.broadcast %cst_9 : f32 to vector<8x128xf32>
    %16 = arith.select %13, %14, %15 : vector<8x128xi1>, vector<8x128xf32>
    %c1 = arith.constant 1 : index
    %c0_10 = arith.constant 0 : index
    %c0_11 = arith.constant 0 : index
    %17 = vector.load %arg2[%c1, %c0_10, %c0_11] : memref<8x8x128xf32, #tpu.memory_space<vmem>>, vector<1x8x128xf32>
    %18 = vector.shape_cast %17 : vector<1x8x128xf32> to vector<8x128xf32>
    %19 = vector.shape_cast %16 : vector<8x128xf32> to vector<1x8x128xf32>
    tpu.vector_store %arg2[%c1, %c0_10, %c0_11], %19 {strides = array<i32>} : memref<8x8x128xf32, #tpu.memory_space<vmem>>, vector<1x8x128xf32>,
    %cst_12 = arith.constant 6.000000e+00 : f32
    %20 = vector.broadcast %cst_12 : f32 to vector<8x128xf32>
    %21 = arith.cmpf oeq, %3, %20 : vector<8x128xf32>
    %cst_13 = arith.constant 0.333333343 : f32
    %cst_14 = arith.constant 0.000000e+00 : f32
    %22 = vector.broadcast %cst_13 : f32 to vector<8x128xf32>
    %23 = vector.broadcast %cst_14 : f32 to vector<8x128xf32>
    %24 = arith.select %21, %22, %23 : vector<8x128xi1>, vector<8x128xf32>
    %c2 = arith.constant 2 : index
    %c0_15 = arith.constant 0 : index
    %c0_16 = arith.constant 0 : index
    %25 = vector.load %arg2[%c2, %c0_15, %c0_16] : memref<8x8x128xf32, #tpu.memory_space<vmem>>, vector<1x8x128xf32>
    %26 = vector.shape_cast %25 : vector<1x8x128xf32> to vector<8x128xf32>
    %27 = vector.shape_cast %24 : vector<8x128xf32> to vector<1x8x128xf32>
    tpu.vector_store %arg2[%c2, %c0_15, %c0_16], %27 {strides = array<i32>} : memref<8x8x128xf32, #tpu.memory_space<vmem>>, vector<1x8x128xf32>,
    %cst_17 = arith.constant 5.000000e+00 : f32
    %28 = vector.broadcast %cst_17 : f32 to vector<8x128xf32>
    %29 = arith.cmpf oeq, %3, %28 : vector<8x128xf32>
    %cst_18 = arith.constant 2.500000e-01 : f32
    %cst_19 = arith.constant 0.000000e+00 : f32
    %30 = vector.broadcast %cst_18 : f32 to vector<8x128xf32>
    %31 = vector.broadcast %cst_19 : f32 to vector<8x128xf32>
    %32 = arith.select %29, %30, %31 : vector<8x128xi1>, vector<8x128xf32>
    %c3 = arith.constant 3 : index
    %c0_20 = arith.constant 0 : index
    %c0_21 = arith.constant 0 : index
    %33 = vector.load %arg2[%c3, %c0_20, %c0_21] : memref<8x8x128xf32, #tpu.memory_space<vmem>>, vector<1x8x128xf32>
    %34 = vector.shape_cast %33 : vector<1x8x128xf32> to vector<8x128xf32>
    %35 = vector.shape_cast %32 : vector<8x128xf32> to vector<1x8x128xf32>
    tpu.vector_store %arg2[%c3, %c0_20, %c0_21], %35 {strides = array<i32>} : memref<8x8x128xf32, #tpu.memory_space<vmem>>, vector<1x8x128xf32>,
    %cst_22 = arith.constant 4.000000e+00 : f32
    %36 = vector.broadcast %cst_22 : f32 to vector<8x128xf32>
    %37 = arith.cmpf oeq, %3, %36 : vector<8x128xf32>
    %cst_23 = arith.constant 2.000000e-01 : f32
    %cst_24 = arith.constant 0.000000e+00 : f32
    %38 = vector.broadcast %cst_23 : f32 to vector<8x128xf32>
    %39 = vector.broadcast %cst_24 : f32 to vector<8x128xf32>
    %40 = arith.select %37, %38, %39 : vector<8x128xi1>, vector<8x128xf32>
    %c4 = arith.constant 4 : index
    %c0_25 = arith.constant 0 : index
    %c0_26 = arith.constant 0 : index
    %41 = vector.load %arg2[%c4, %c0_25, %c0_26] : memref<8x8x128xf32, #tpu.memory_space<vmem>>, vector<1x8x128xf32>
    %42 = vector.shape_cast %41 : vector<1x8x128xf32> to vector<8x128xf32>
    %43 = vector.shape_cast %40 : vector<8x128xf32> to vector<1x8x128xf32>
    tpu.vector_store %arg2[%c4, %c0_25, %c0_26], %43 {strides = array<i32>} : memref<8x8x128xf32, #tpu.memory_space<vmem>>, vector<1x8x128xf32>,
    %cst_27 = arith.constant 3.000000e+00 : f32
    %44 = vector.broadcast %cst_27 : f32 to vector<8x128xf32>
    %45 = arith.cmpf oeq, %3, %44 : vector<8x128xf32>
    %cst_28 = arith.constant 0.166666672 : f32
    %cst_29 = arith.constant 0.000000e+00 : f32
    %46 = vector.broadcast %cst_28 : f32 to vector<8x128xf32>
    %47 = vector.broadcast %cst_29 : f32 to vector<8x128xf32>
    %48 = arith.select %45, %46, %47 : vector<8x128xi1>, vector<8x128xf32>
    %c5 = arith.constant 5 : index
    %c0_30 = arith.constant 0 : index
    %c0_31 = arith.constant 0 : index
    %49 = vector.load %arg2[%c5, %c0_30, %c0_31] : memref<8x8x128xf32, #tpu.memory_space<vmem>>, vector<1x8x128xf32>
    %50 = vector.shape_cast %49 : vector<1x8x128xf32> to vector<8x128xf32>
    %51 = vector.shape_cast %48 : vector<8x128xf32> to vector<1x8x128xf32>
    tpu.vector_store %arg2[%c5, %c0_30, %c0_31], %51 {strides = array<i32>} : memref<8x8x128xf32, #tpu.memory_space<vmem>>, vector<1x8x128xf32>,
    %cst_32 = arith.constant 2.000000e+00 : f32
    %52 = vector.broadcast %cst_32 : f32 to vector<8x128xf32>
    %53 = arith.cmpf oeq, %3, %52 : vector<8x128xf32>
    %cst_33 = arith.constant 0.142857149 : f32
    %cst_34 = arith.constant 0.000000e+00 : f32
    %54 = vector.broadcast %cst_33 : f32 to vector<8x128xf32>
    %55 = vector.broadcast %cst_34 : f32 to vector<8x128xf32>
    %56 = arith.select %53, %54, %55 : vector<8x128xi1>, vector<8x128xf32>
    %c6 = arith.constant 6 : index
    %c0_35 = arith.constant 0 : index
    %c0_36 = arith.constant 0 : index
    %57 = vector.load %arg2[%c6, %c0_35, %c0_36] : memref<8x8x128xf32, #tpu.memory_space<vmem>>, vector<1x8x128xf32>
    %58 = vector.shape_cast %57 : vector<1x8x128xf32> to vector<8x128xf32>
    %59 = vector.shape_cast %56 : vector<8x128xf32> to vector<1x8x128xf32>
    tpu.vector_store %arg2[%c6, %c0_35, %c0_36], %59 {strides = array<i32>} : memref<8x8x128xf32, #tpu.memory_space<vmem>>, vector<1x8x128xf32>,
    %cst_37 = arith.constant 1.000000e+00 : f32
    %60 = vector.broadcast %cst_37 : f32 to vector<8x128xf32>
    %61 = arith.cmpf oeq, %3, %60 : vector<8x128xf32>
    %cst_38 = arith.constant 1.250000e-01 : f32
    %cst_39 = arith.constant 0.000000e+00 : f32
    %62 = vector.broadcast %cst_38 : f32 to vector<8x128xf32>
    %63 = vector.broadcast %cst_39 : f32 to vector<8x128xf32>
    %64 = arith.select %61, %62, %63 : vector<8x128xi1>, vector<8x128xf32>
    %c7 = arith.constant 7 : index
    %c0_40 = arith.constant 0 : index
    %c0_41 = arith.constant 0 : index
    %65 = vector.load %arg2[%c7, %c0_40, %c0_41] : memref<8x8x128xf32, #tpu.memory_space<vmem>>, vector<1x8x128xf32>
    %66 = vector.shape_cast %65 : vector<1x8x128xf32> to vector<8x128xf32>
    %67 = vector.shape_cast %64 : vector<8x128xf32> to vector<1x8x128xf32>
    tpu.vector_store %arg2[%c7, %c0_40, %c0_41], %67 {strides = array<i32>} : memref<8x8x128xf32, #tpu.memory_space<vmem>>, vector<1x8x128xf32>,
    return
  }
  func.func @transform_0(%arg0: i32) -> (i32, i32) {
    %c0_i32 = arith.constant 0 : i32
    %c0_i32_0 = arith.constant 0 : i32
    return %arg0, %c0_i32 : i32, i32
  }
  func.func @transform_1(%arg0: i32) -> (i32, i32, i32) {
    %c0_i32 = arith.constant 0 : i32
    %c0_i32_0 = arith.constant 0 : i32
    %c0_i32_1 = arith.constant 0 : i32
    return %c0_i32, %arg0, %c0_i32_0 : i32, i32, i32
  }
}

</mosaic_0001>

<bundles_post_ra>
// kernel: tpu_custom_call.1
= control target key start
LH: loop header
LB: loop body
LE: loop exit
PB: predicated region body
PF: predicated region fallthrough
CT: control target
= control target key end

     0   :  { %6 = vsyncpa [#allocation3], 0  ;;  %s599_s0 = inlined_call_operand.hbm [shape: f32[16,128], index: 0, kind: input, shape index: {}]   ;;  %s600_s1 = inlined_call_operand.hbm [shape: f32[8,16,128], index: 1, kind: output, shape index: {}]  }
   0x1   :  { %8 = vsyncpa [#allocation3 + $0x1], 0 }
   0x2   :  { %9 = vsyncpa [#allocation4], 0 }
   0x3   :  { %11 = vsyncpa [#allocation4 + $0x1], 0  ;;  %s435_s6 = smov 0   ;;  %s437_s7 = smov 0  }
   0x4   :  { %s439_s8 = smov 0   ;;  %s441_s9 = smov 0  }
   0x5 LB: > { %s456_s10 = sadd.s32 4294967295, %s417_s9   ;;  %s252_s11 = sadd.s32 4294967294, %s417_s9   ;;  %s417_s9 = sphi %s441_s9, %s615_s9   ;;  %s413_s8 = sphi %s439_s8, %s614_s8   ;;  %s409_s7 = sphi %s437_s7, %s613_s7   ;;  %s405_s6 = sphi %s435_s6, %s612_s6  }
   0x6   : > { %s460_s12 = sadd.s32 1, %s417_s9   ;;  %s24_s13 = sadd.s32 1, %s413_s8 }
   0x7   : > { %s21_s14 = ssub.s32 %s417_s9, %s460_s12  ;;  %p31_p0 = scmp.ne.s32.totalorder %s413_s8, %s409_s7 }
   0x8   : > { %p22_p1 = scmp.eq.s32.totalorder %s21_s14, 0  ;;  %p32_p2 = scmp.eq.s32.totalorder %s417_s9, 0 }
   0x9   : > { %p37_p3 = scmp.ne.s32.totalorder %s409_s7, %s405_s6  ;;  %p38_p4 = scmp.eq.s32.totalorder %s456_s10, 0 }
   0xa   : > { %s472_s15 = scalar_select %p22_p1, %s413_s8, %s24_s13  }
   0xb   : > { %p474_p5 = por %p32_p2, %p31_p0  ;;  %p478_p6 = por %p38_p4, %p37_p3 }
   0xc   : > { %p61_p7 = scmp.eq.s32.totalorder %s456_s10, 1  ;;  %p67_p8 = scmp.eq.s32.totalorder %s252_s11, 1 }
   0xd   : > { %p283_p10 = scmp.lt.s32.totalorder %s417_s9, 2  ;;  %s87_s20 = sand.u32 1, %s413_s8  }
   0xe   : > { %p485_p11 = por %p61_p7, %p31_p0  ;;  %p489_p12 = por %p67_p8, %p37_p3 }
   0xf   : > { %s256_s21 = sshll.u32 %s417_s9, 7  ;;  %s255_s22 = sshll.u32 %s87_s20, 3 }
  0x10   : > { %s604_s18 = scalar_select %p485_p11, 1, 0 }
  0x11   : > { %s605_s19 = scalar_select %p489_p12, 1, 0 }
  0x12   : > { %s498_s25 = scalar_lea.hbm %s599_s0, %s256_s21  ;;  %s91_s26 = scalar_lea.vmem [#allocation2], %s255_s22 }
  0x13   : > { %s98_s27 = sshll.u32 %s91_s26, 4  ;;  %p502_p13 = pnand %p283_p10, %p474_p5  ;;  %s506_s27 = int_to_ptr.vmem [resolvable:$true] %s98_s27 }
  0x14   : > { %s88_s29 = scalar_lea.sflag [#allocation3], %s87_s20  ;;  %s321_s30 = scalar_lea.hbm %s498_s25, 128 }
  0x15   : > { %p322_p2 = scmp.ne.s32.totalorder %s498_s25, %s321_s30  ;;  %p323_p3 = pneg %p502_p13 }
  0x16   : > { %s326_s4 = scalar_lea.hbm %s599_s0, 256  ;;  %p327_p5 = scmp.lt.u32.totalorder %s498_s25, %s599_s0 }
  0x17   : > { %p324_p4 = pnand %p323_p3, %p322_p2  ;;  %p328_p8 = scmp.lt.u32.totalorder %s326_s4, %s321_s30 }
  0x18   : > { %p330_p9 = scmp.lt.u32.totalorder %s321_s30, %s498_s25 }
  0x19   : > { %p325_p7 = pneg %p324_p4  ;;  %p329_p10 = por %p328_p8, %p327_p5 }
  0x1b   : > { %p331_p0 = por %p330_p9, %p329_p10 }
  0x1d   : > { %p332_p1 = pnand %p331_p0, %p325_p7 }
  0x1f   : > { %335 = shalt.err (!%p332_p1)
}
  0x20   : > { %s336_s13 = scalar_lea.vmem %s506_s27, 128  ;;  %s419_s14 = smov [#allocation2]  }
  0x21   : > { %p337_p2 = scmp.ne.s32.totalorder %s506_s27, %s336_s13  ;;  %s341_s16 = sshll.u32 %s419_s14, 4  ;;  %s342_s16 = int_to_ptr.vmem [resolvable:$false] %s341_s16 }
  0x22   : > { %s343_s20 = scalar_lea.vmem %s342_s16, 256  ;;  %p344_p11 = scmp.lt.s32.totalorder %s506_s27, %s342_s16 }
  0x23   : > { %p339_p4 = pnand %p337_p2, %p323_p3  ;;  %p345_p5 = scmp.lt.s32.totalorder %s343_s20, %s336_s13 }
  0x25   : > { %p340_p12 = pneg %p339_p4  ;;  %p346_p8 = por %p345_p5, %p344_p11 }
  0x27   : > { %p347_p9 = pnand %p346_p8, %p340_p12 }
  0x29   : > { %350 = shalt.err (!%p347_p9)
}
  0x2a   : > { %278 = dma.hbm_to_vmem [thread:$0]  (!%p502_p13), %s498_s25, 128, %s506_s27, %s88_s29  }
  0x2b   : > { %p607_p0 = scmp.lt.s32.totalorder %s417_s9, 3  ;;  %p608_p1 = scmp.ge.s32.totalorder %s417_s9, 1 }
  0x2d   : > { %p104_p3 = pnand %p608_p1, %p607_p0 }
  0x2e   : > { %s540_s21 = sand.u32 (!%p104_p3), 1, %s409_s7  }
  0x2f   : > { %107 = sbr.rel (%p104_p3) target bundleno = 83 (0x53), region = 24  ;;  %s258_s22 = sshll.u32 (!%p104_p3), %s540_s21, 3 }
  0x30   : > { %s110_s23 = scalar_lea.sflag (!%p104_p3), [#allocation3], %s540_s21  ;;  %s113_s24 = scalar_lea.vmem (!%p104_p3), [#allocation2], %s258_s22 }
  0x36   : > { %396 = dma.done.wait (%p478_p6), %s110_s23, 128  }
  0x37   : > { %398 = vsyncadd (%p478_p6), %s110_s23, 4294967168  ;;  %s259_s25 = sshll.u32 %s540_s21, 6  ;;  %v132_v0 = vld [vmem:[%s113_s24] sm:$0xff]  ;;  %s268_s28 = sshll.u32 %s456_s10, 7  ;;  %v420_v3 = vmov 0.0  }
  0x38   : > { %v133_v1 = vmul.f32 8.0, %v132_v0  ;;  %s131_s26 = scalar_lea.vmem [#allocation5], %s259_s25  ;;  %s555_s29 = scalar_lea.hbm %s600_s1, %s268_s28 }
  0x39   : > { %s179_s27 = sshll.u32 %s131_s26, 4  ;;  %s167_s30 = scalar_lea.sflag [#allocation4], %s540_s21  ;;  %s550_s27 = int_to_ptr.vmem [resolvable:$true] %s179_s27 }
  0x3a   : > { %v134_v2 = vceil.f32 %v133_v1  ;;  %s351_s2 = scalar_lea.vmem %s550_s27, 1024  ;;  %p609_p11 = scmp.ne.s32.totalorder %s604_s18, 0 }
  0x3b   : > { %p352_p6 = scmp.ne.s32.totalorder %s550_s27, %s351_s2  ;;  %s421_s3 = smov [#allocation5]  }
  0x3c   : > { %vm135_vm0 = vcmp.eq.f32.partialorder %v134_v2, 8.0  ;;  %vm138_vm1 = vcmp.eq.f32.partialorder %v134_v2, 7.0  ;;  %vm142_vm2 = vcmp.eq.f32.partialorder %v134_v2, 6.0  ;;  %vm146_vm3 = vcmp.eq.f32.partialorder %v134_v2, 5.0  ;;  %s355_s4 = sshll.u32 %s421_s3, 4  ;;  %s356_s4 = int_to_ptr.vmem [resolvable:$false] %s355_s4 }
  0x3d   : > { %v136_v4 = vsel %vm135_vm0, 1.0, %v420_v3  ;;  %v139_v5 = vsel %vm138_vm1, 0.5, %v420_v3  ;;  %v143_v6 = vsel %vm142_vm2, 0.33333334, %v420_v3  ;;  %v147_v7 = vsel %vm146_vm3, 0.25, %v420_v3  ;;  %p353_p12 = pnand %p352_p6, %p609_p11  ;;  %s357_s5 = scalar_lea.vmem %s356_s4, 2048 }
  0x3e   : > { %137 = vst [vmem:[%s131_s26] sm:$0xff] %v136_v4  ;;  %260 = vst [vmem:[%s131_s26 + $0x8] sm:$0xff] %v139_v5  ;;  %vm150_vm4 = vcmp.eq.f32.partialorder %v134_v2, 4.0  ;;  %vm154_vm5 = vcmp.eq.f32.partialorder %v134_v2, 3.0  ;;  %vm158_vm6 = vcmp.eq.f32.partialorder %v134_v2, 2.0  ;;  %vm162_vm7 = vcmp.eq.f32.partialorder %v134_v2, 1.0  ;;  %p358_p7 = scmp.lt.s32.totalorder %s550_s27, %s356_s4  ;;  %p359_p10 = scmp.lt.s32.totalorder %s357_s5, %s351_s2 }
  0x3f   : > { %261 = vst [vmem:[%s131_s26 + $0x10] sm:$0xff] %v143_v6  ;;  %262 = vst [vmem:[%s131_s26 + $0x18] sm:$0xff] %v147_v7  ;;  %v151_v8 = vsel %vm150_vm4, 0.2, %v420_v3  ;;  %v155_v9 = vsel %vm154_vm5, 0.16666667, %v420_v3  ;;  %p354_p13 = pneg %p353_p12 }
  0x40   : > { %v159_v10 = vsel %vm158_vm6, 0.14285715, %v420_v3  ;;  %263 = vst [vmem:[%s131_s26 + $0x20] sm:$0xff] %v151_v8  ;;  %264 = vst [vmem:[%s131_s26 + $0x28] sm:$0xff] %v155_v9  ;;  %v163_v11 = vsel %vm162_vm7, 0.125, %v420_v3  ;;  %p360_p2 = por %p359_p10, %p358_p7 }
  0x41   : > { %265 = vst [vmem:[%s131_s26 + $0x30] sm:$0xff] %v159_v10  ;;  %266 = vst [vmem:[%s131_s26 + $0x38] sm:$0xff] %v163_v11 }
  0x42   : > { %p361_p4 = pnand %p360_p2, %p354_p13 }
  0x44   : > { %364 = shalt.err (!%p361_p4)
}
  0x45   : > { %s365_s11 = scalar_lea.hbm %s555_s29, 1024  ;;  %s369_s16 = scalar_lea.hbm %s600_s1, 2048 }
  0x46   : > { %p366_p5 = scmp.ne.s32.totalorder %s555_s29, %s365_s11  ;;  %p370_p0 = scmp.lt.u32.totalorder %s555_s29, %s600_s1 }
  0x47   : > { %p371_p1 = scmp.lt.u32.totalorder %s369_s16, %s365_s11  ;;  %p373_p6 = scmp.lt.u32.totalorder %s365_s11, %s555_s29 }
  0x48   : > { %p367_p8 = pnand %p366_p5, %p609_p11 }
  0x49   : > { %p372_p3 = por %p371_p1, %p370_p0 }
  0x4a   : > { %p368_p9 = pneg %p367_p8 }
  0x4b   : > { %p374_p12 = por %p373_p6, %p372_p3 }
  0x4d   : > { %p375_p13 = pnand %p374_p12, %p368_p9 }
  0x4f   : > { %378 = shalt.err (!%p375_p13)
}
  0x50   : > { %s422_s23 = smov 128   ;;  %s423_s24 = smov 256  }
  0x51   : > { %s424_s25 = smov 8  }
  0x52   : > { %273 = dma.vmem_to_hbm [thread:$0]  (%p609_p11), %s550_s27, 1024, %s555_s29, %s167_s30, %s422_s23, %s423_s24, %s424_s25  }
  0x53 PF: > { %s194_s26 = sand.u32 1, %s405_s6   ;;  %p610_p7 = scmp.ne.s32.totalorder %s605_s19, 0 }
  0x54   : > { %p611_p10 = scmp.ge.s32.totalorder %s417_s9, 2  ;;  %s195_s28 = scalar_lea.sflag [#allocation4], %s194_s26 }
  0x56   : > { %p280_p2 = pnand %p611_p10, %p610_p7 }
  0x58   : > { %400 = dma.done.wait (!%p280_p2), %s195_s28, 1024  }
  0x59   : > { %402 = vsyncadd (!%p280_p2), %s195_s28, 4294966272  ;;  %p14_p4 = scmp.ge.s32.totalorder %s460_s12, 4   ;;  %s612_s6 = smov %s409_s7 }
  0x5a   : > { %s613_s7 = smov %s413_s8  ;;  %s614_s8 = smov %s472_s15 }
  0x5b   : > { %s615_s9 = smov %s460_s12  ;;  %16 = sbr.rel (!%p14_p4) target bundleno = 5 (0x5), region = 76 }
  0x62   :  { %200 = vsyncpa [#allocation3], 1 }
  0x63   :  { %202 = vsyncpa [#allocation3 + $0x1], 1 }
  0x64   :  { %203 = vsyncpa [#allocation4], 1 }
  0x65   :  { %205 = vsyncpa [#allocation4 + $0x1], 1 }

</bundles_post_ra>
